<compile_context>
chip_gen: v5e
topology: v5e:2x2
jax: 0.10.0
libtpu: 0.0.40
codegen_flags: <defaults>
</compile_context>

<pallas_src>
import functools

import jax
import jax.numpy as jnp
from jax.experimental import pallas as pl
from jax.experimental.pallas import tpu as pltpu


def make_pe_table(max_len, num_hiddens, dtype=jnp.float32):
    """Sinusoidal table identical to the PyTorch module's buffer (leading 1-dim dropped)."""
    position = (
        jnp.arange(max_len, dtype=jnp.float32)[:, None]
        / jnp.power(
            10000.0,
            jnp.arange(0, num_hiddens, 2, dtype=jnp.float32) / num_hiddens,
        )
    )
    pe = jnp.zeros((max_len, num_hiddens), dtype=jnp.float32)
    pe = pe.at[:, 0::2].set(jnp.sin(position))
    pe = pe.at[:, 1::2].set(jnp.cos(position))
    return pe.astype(dtype)


# --------------------------------------------------------------------------- kernel ----


def _posenc_kernel(seed_ref, x_ref, pe_ref, o_ref, *, train, keep_threshold, inv_keep,
                   n_cols):
    # seed_ref: SMEM (1,) int32 scalar-prefetch
    # x_ref/o_ref: (Bb, tc) VMEM tiles of the flattened (B, S*D) view
    # pe_ref:      (1,  tc) VMEM tile of the flattened PE slice (broadcast over batch)
    y = x_ref[...] + pe_ref[...]                      # VPU elementwise add, lane-dense

    if train:
        bb, tc = y.shape
        j = pl.program_id(0)                          # column block (outer)
        b = pl.program_id(1)                          # batch block (inner)
        rows = jax.lax.broadcasted_iota(jnp.int32, y.shape, 0).astype(jnp.uint32)
        cols = jax.lax.broadcasted_iota(jnp.int32, y.shape, 1).astype(jnp.uint32)
        g_rows = rows + (b * bb).astype(jnp.uint32)
        g_cols = cols + (j * tc).astype(jnp.uint32)
        lin = g_rows * jnp.uint32(n_cols & 0xFFFFFFFF) + g_cols
        # lowbias32-style integer hash of (global element index, seed): decorrelates tiles.
        h = lin * jnp.uint32(0x9E3779B9) + seed_ref[0].astype(jnp.uint32)
        h = h ^ (h >> 16)
        h = h * jnp.uint32(0x7FEB352D)
        h = h ^ (h >> 15)
        h = h * jnp.uint32(0x846CA68B)
        h = h ^ (h >> 16)
        keep = h < jnp.uint32(keep_threshold)         # P(keep) = 1 - dropout_p
        y = jnp.where(keep, y * inv_keep, jnp.zeros_like(y))

    o_ref[...] = y.astype(o_ref.dtype)


# ---------------------------------------------------------------------- tile sizing ----


def _divisors(n):
    ds = set()
    i = 1
    while i * i <= n:
        if n % i == 0:
            ds.add(i)
            ds.add(n // i)
        i += 1
    return sorted(ds)


def _sublane_pack(itemsize):
    return {4: 8, 2: 16, 1: 32}.get(itemsize, 8)


def _vmem_capacity_bytes():
    try:
        cap = getattr(pltpu.get_tpu_info(), "vmem_capacity_bytes", None)
        if cap:
            return int(cap)
    except Exception:
        pass
    return None


def _default_vmem_budget():
    # Per-generation working-set budget: ~1/3 of physical VMEM, capped at 40 MiB.
    # v5e/v6e (128 MiB) -> 40 MiB, v7x (64 MiB) -> ~21 MiB; unknown -> ~21 MiB (safe).
    cap = _vmem_capacity_bytes() or (64 << 20)
    return max(4 << 20, min(cap // 3, 40 << 20))


def _choose_tiles(B, N, itemsize, budget_bytes, train):
    """Pick (batch_block, col_block) for the flattened (B, S*D) view.

    Per-step VMEM ~= x/out double-buffered (4*itemsize per element) + PE double buffer
    + elementwise temporaries (extra ~3 live arrays in eval, ~6 with fused dropout).
    """
    temps = 6 if train else 3
    per_elem = 4 * itemsize + 4 * temps
    pe_per_col = 2 * itemsize

    def fits(bb, tc):
        return bb * tc * per_elem + tc * pe_per_col <= budget_bytes

    if N % 128 == 0:
        col_cands = sorted((c for c in _divisors(N) if c % 128 == 0), reverse=True)
    else:
        # TODO(synk): S*D not a multiple of 128 -> ragged lane tail lowers to masked stores.
        col_cands = sorted(_divisors(N), reverse=True)

    pack = _sublane_pack(itemsize)
    b_cands = [B] + sorted(
        (b for b in _divisors(B) if b != B and (b % pack == 0 or b == 1)),
        reverse=True,
    )

    bb, tc = b_cands[-1], col_cands[-1]
    done = False
    for cand_bb in b_cands:                 # biggest batch block first (full B preferred)
        for cand_tc in col_cands:           # then biggest lane-aligned column tile
            if fits(cand_bb, cand_tc):
                bb, tc = cand_bb, cand_tc
                done = True
                break
        if done:
            break

    # v7x has 2 TensorCores: keep >= 2 grid steps when it costs no alignment.
    if (B // bb) * (N // tc) == 1:
        if tc % 256 == 0:
            tc //= 2
        elif bb % (2 * pack) == 0:
            bb //= 2
    return bb, tc


# -------------------------------------------------------------------------- wrapper ----


def positional_encoding_forward(x, pe_table, *, dropout_p=0.2, train=False, seed=0,
                                vmem_budget_bytes=None):
    """out = dropout(x + PE[:S]), x: [B, S, D], pe_table: [max_len, D]."""
    B, S, D = x.shape
    max_len, d_pe = pe_table.shape
    if S > max_len:
        raise ValueError(f"seq_len {S} exceeds max_len {max_len}")
    if d_pe != D:
        raise ValueError(f"pe_table feature dim {d_pe} != d_model {D}")
    if not (0.0 <= float(dropout_p) < 1.0):
        raise ValueError("dropout_p must be in [0, 1)")

    N = S * D
    itemsize = jnp.dtype(x.dtype).itemsize

    apply_dropout = bool(train) and float(dropout_p) > 0.0
    keep_prob = 1.0 - float(dropout_p)
    keep_threshold = min(int(keep_prob * float(1 << 32)), (1 << 32) - 1)
    inv_keep = 1.0 / keep_prob

    budget = _default_vmem_budget() if vmem_budget_bytes is None else int(vmem_budget_bytes)
    Bb, tc = _choose_tiles(B, N, itemsize, budget, apply_dropout)
    grid = (N // tc, B // Bb)               # column blocks OUTER, batch blocks INNER

    # Lane-dense flattened views (reshape of contiguous arrays: layout plumbing only).
    x_flat = x.reshape(B, N)
    pe_flat = pe_table[:S].astype(x.dtype).reshape(1, N)
    seed_arr = jnp.asarray([seed], dtype=jnp.int32)

    kernel = functools.partial(
        _posenc_kernel,
        train=apply_dropout,
        keep_threshold=keep_threshold,
        inv_keep=inv_keep,
        n_cols=N,
    )

    cost = pl.CostEstimate(
        flops=2 * B * N,
        transcendentals=0,
        bytes_accessed=(2 * B * N + N) * itemsize,
    )

    cap = _vmem_capacity_bytes()
    vmem_limit = budget + (8 << 20)
    if cap is not None:
        vmem_limit = min(vmem_limit, cap)

    out_flat = pl.pallas_call(
        kernel,
        out_shape=jax.ShapeDtypeStruct((B, N), x.dtype),
        grid_spec=pltpu.PrefetchScalarGridSpec(
            num_scalar_prefetch=1,
            grid=grid,
            in_specs=[
                # x: (Bb, tc) tile of the flattened view.
                pl.BlockSpec((Bb, tc), lambda j, b, seed: (b, j)),
                # PE: block index depends only on the outer column axis -> stays resident
                # across the inner batch sweep (one total read of the used PE slice).
                pl.BlockSpec((1, tc), lambda j, b, seed: (0, j)),
            ],
            out_specs=pl.BlockSpec((Bb, tc), lambda j, b, seed: (b, j)),
        ),
        compiler_params=pltpu.CompilerParams(
            dimension_semantics=("parallel", "parallel"),
            vmem_limit_bytes=int(vmem_limit),
        ),
        cost_estimate=cost,
    )(seed_arr, x_flat, pe_flat)

    return out_flat.reshape(B, S, D)


def reference_forward(x, pe_table):
    S = x.shape[1]
    return x + pe_table[None, :S, :]


if __name__ == "__main__":
    d_model = 32
    max_len = 1000
    seq_len = 8
    batch = 2
    dropout_p = 0.2

    key = jax.random.PRNGKey(0)
    x = jax.random.normal(key, (batch, seq_len, d_model), dtype=jnp.float32)
    pe_table = make_pe_table(max_len, d_model)

    # --- eval mode (dropout == identity): must match the reference exactly ---
    out = positional_encoding_forward(x, pe_table, dropout_p=dropout_p, train=False)
    out = jax.block_until_ready(out)
    ref = reference_forward(x, pe_table)
    assert out.shape == (batch, seq_len, d_model)
    assert out.dtype == jnp.float32
    assert jnp.allclose(out, ref, atol=1e-6, rtol=1e-6)

    # --- training mode (fused inverted dropout): semantic sanity checks ---
    out_tr = positional_encoding_forward(
        x, pe_table, dropout_p=dropout_p, train=True, seed=42
    )
    out_tr = jax.block_until_ready(out_tr)
    keep_prob = 1.0 - dropout_p
    kept = out_tr != 0
    frac = float(jnp.mean(kept.astype(jnp.float32)))
    assert abs(frac - keep_prob) < 0.15, f"kept fraction {frac} far from {keep_prob}"
    # Kept entries must equal (x + PE) / keep_prob; dropped entries are exactly zero.
    assert jnp.allclose(
        jnp.where(kept, out_tr * keep_prob, 0.0),
        jnp.where(kept, ref, 0.0),
        atol=1e-5,
        rtol=1e-5,
    )

    print("KERNEL_OK")
</pallas_src>

<mosaic_0001>
module attributes {stable_mosaic.version = 11 : i64} {
  func.func @_posenc_kernel(%arg0: i32, %arg1: i32, %arg2: memref<1xi32, #tpu.memory_space<smem>>, %arg3: memref<2x128xf32, #tpu.memory_space<vmem>>, %arg4: memref<1x128xf32, #tpu.memory_space<vmem>>, %arg5: memref<2x128xf32, #tpu.memory_space<vmem>>) attributes {dimension_semantics = [#tpu.dimension_semantics<parallel>, #tpu.dimension_semantics<parallel>], iteration_bounds = array<i64: 2, 1>, scalar_prefetch = 1 : i64, scratch_operands = 0 : i64, tpu.core_type = #tpu.core_type<tc>, window_params = [{transform_indices = @transform_0, window_bounds = array<i64: 2, 128>}, {transform_indices = @transform_1, window_bounds = array<i64: 1, 128>}, {transform_indices = @transform_2, window_bounds = array<i64: 2, 128>}]} {
    %c0 = arith.constant 0 : index
    %c0_0 = arith.constant 0 : index
    %0 = vector.load %arg3[%c0, %c0_0] : memref<2x128xf32, #tpu.memory_space<vmem>>, vector<2x128xf32>
    %c0_1 = arith.constant 0 : index
    %c0_2 = arith.constant 0 : index
    %1 = vector.load %arg4[%c0_1, %c0_2] : memref<1x128xf32, #tpu.memory_space<vmem>>, vector<1x128xf32>
    %2 = vector.broadcast %1 : vector<1x128xf32> to vector<2x128xf32>
    %3 = arith.addf %0, %2 : vector<2x128xf32>
    %c0_3 = arith.constant 0 : index
    %c0_4 = arith.constant 0 : index
    %4 = vector.load %arg5[%c0_3, %c0_4] : memref<2x128xf32, #tpu.memory_space<vmem>>, vector<2x128xf32>
    tpu.vector_store %arg5[%c0_3, %c0_4], %3 {strides = array<i32>} : memref<2x128xf32, #tpu.memory_space<vmem>>, vector<2x128xf32>,
    return
  }
  func.func @transform_0(%arg0: i32, %arg1: i32, %arg2: memref<1xi32, #tpu.memory_space<smem>>) -> (i32, i32) {
    %c0_i32 = arith.constant 0 : i32
    return %arg1, %arg0 : i32, i32
  }
  func.func @transform_1(%arg0: i32, %arg1: i32, %arg2: memref<1xi32, #tpu.memory_space<smem>>) -> (i32, i32) {
    %c0_i32 = arith.constant 0 : i32
    %c0_i32_0 = arith.constant 0 : i32
    return %c0_i32, %arg0 : i32, i32
  }
  func.func @transform_2(%arg0: i32, %arg1: i32, %arg2: memref<1xi32, #tpu.memory_space<smem>>) -> (i32, i32) {
    %c0_i32 = arith.constant 0 : i32
    return %arg1, %arg0 : i32, i32
  }
}

</mosaic_0001>

<bundles_post_ra>
// kernel: tpu_custom_call.1
= control target key start
LH: loop header
LB: loop body
LE: loop exit
PB: predicated region body
PF: predicated region fallthrough
CT: control target
= control target key end

     0   :  { %9 = vsyncpa [#allocation5], 0  ;;  %s646_s0 = inlined_call_operand.<no memory space> [shape: s32[1], index: 0, kind: input, shape index: {}]   ;;  %s647_s1 = inlined_call_operand.hbm [shape: f32[2,256], index: 1, kind: input, shape index: {}]   ;;  %s648_s2 = inlined_call_operand.vmem [shape: f32[1,256], index: 2, kind: input, shape index: {}]   ;;  %s649_s3 = inlined_call_operand.hbm [shape: f32[2,256], index: 3, kind: output, shape index: {}]  }
   0x1   :  { %11 = vsyncpa [#allocation5 + $0x1], 0 }
   0x2   :  { %12 = vsyncpa [#allocation6], 0 }
   0x3   :  { %14 = vsyncpa [#allocation6 + $0x1], 0  ;;  %s521_s12 = smov 0   ;;  %s523_s13 = smov 0  }
   0x4   :  { %s525_s14 = smov 0   ;;  %s527_s0 = smov 0  }
   0x5   :  { %s529_s15 = smov 0   ;;  %s531_s16 = smov 0  }
   0x6 LB: > { %s311_s17 = sadd.s32 4294967295, %s499_s16   ;;  %s312_s18 = sadd.s32 4294967294, %s499_s16   ;;  %s499_s16 = sphi %s531_s16, %s20_s16   ;;  %s495_s15 = sphi %s529_s15, %s658_s15   ;;  %s491_s0 = sphi %s527_s0, %s657_s0   ;;  %s487_s14 = sphi %s525_s14, %s656_s14   ;;  %s483_s13 = sphi %s523_s13, %s655_s13   ;;  %s479_s12 = sphi %s521_s12, %s654_s12  }
   0x7   : > { %s32_s19 = sadd.s32 1, %s495_s15  ;;  %s41_s20 = sadd.s32 1, %s487_s14 }
   0x8   : > { %p34_p0 = scmp.ge.s32.totalorder %s32_s19, 2  ;;  %p48_p1 = scmp.ne.s32.totalorder %s487_s14, %s483_s13 }
   0x9   : > { %p49_p2 = scmp.eq.s32.totalorder %s499_s16, 0  ;;  %p54_p3 = scmp.ne.s32.totalorder %s483_s13, %s479_s12 }
   0xa   : > { %s660_s19 = smov (%p34_p0, %s32_s19), 0  ;;  %p55_p5 = scmp.eq.s32.totalorder %s311_s17, 0 }
   0xb   : > { %p562_p4 = por %p49_p2, %p48_p1  ;;  %s37_s22 = ssub.s32 %s495_s15, %s660_s19 }
   0xc   : > { %p106_p6 = scmp.eq.s32.totalorder %s311_s17, 1  ;;  %p39_p7 = scmp.eq.s32.totalorder %s37_s22, 0 }
   0xd   : > { %p568_p8 = por %p55_p5, %p54_p3  ;;  %p112_p10 = scmp.eq.s32.totalorder %s312_s18, 1 }
   0xe   : > { %p572_p9 = por %p106_p6, %p48_p1  ;;  %p314_p12 = scmp.ge.s32.totalorder %s499_s16, 2 }
   0xf   : > { %s577_s25 = scalar_select %p39_p7, %s487_s14, %s41_s20  }
  0x10   : > { %p579_p11 = por %p112_p10, %p54_p3  ;;  %p336_p13 = scmp.lt.s32.totalorder %s499_s16, 2 }
  0x11   : > { %s132_s27 = sand.u32 1, %s487_s14   ;;  %s316_s29 = sshll.u32 %s495_s15, 1 }
  0x12   : > { %s315_s28 = sshll.u32 %s132_s27, 1  ;;  %s142_s5 = scalar_lea.hbm %s647_s1, %s316_s29 }
  0x13   : > { %s136_s6 = scalar_lea.vmem [#allocation4], %s315_s28  ;;  %s144_s8 = sshll.u32 %s142_s5, 4  ;;  %s145_s8 = int_to_ptr.hbm [resolvable:$true] %s144_s8 }
  0x14   : > { %s146_s7 = sshll.u32 %s136_s6, 4  ;;  %p329_p0 = pnand %p336_p13, %p562_p4  ;;  %s147_s7 = int_to_ptr.vmem [resolvable:$true] %s146_s7 }
  0x15   : > { %p317_p1 = scmp.ge.s32.totalorder %s499_s16, 1  ;;  %p157_p2 = scmp.lt.s32.totalorder %s499_s16, 3 }
  0x16   : > { %s133_s9 = scalar_lea.sflag [#allocation5], %s132_s27 }
  0x17   : > { %331 = dma.hbm_to_vmem [thread:$0]  (!%p329_p0), %s145_s8, 32, %s147_s7, %s133_s9  }
  0x18   : > { %p158_p3 = pnand %p317_p1, %p157_p2 }
  0x19   : > { %s595_s10 = sand.u32 (!%p158_p3), 1, %s483_s13  }
  0x1a   : > { %161 = sbr.rel (%p158_p3) target bundleno = 49 (0x31), region = 28  ;;  %s318_s11 = sshll.u32 (!%p158_p3), %s595_s10, 1 }
  0x1b   : > { %s164_s17 = scalar_lea.sflag (!%p158_p3), [#allocation5], %s595_s10  ;;  %s167_s18 = scalar_lea.vmem (!%p158_p3), [#allocation4], %s318_s11 }
  0x1f   : > { %470 = dma.done.wait (%p568_p8), %s164_s17, 32  }
  0x20   : > { %472 = vsyncadd (%p568_p8), %s164_s17, 4294967264  ;;  %p192_p4 = scmp.lt.s32.totalorder %s491_s0, 1  ;;  %s321_s21 = sshll.u32 %s491_s0, 1  ;;  %v195_v0 = vld [vmem:[%s167_s18] sm:$0x3] }
  0x21   : > { %s215_s4 = scalar_lea.hbm %s649_s3, %s321_s21  ;;  %s191_s5 = scalar_lea.vmem [#allocation7], %s318_s11 }
  0x22   : > { %s193_s20 = scalar_select %p192_p4, %s491_s0, 1 }
  0x23   : > { %s217_s6 = sshll.u32 %s191_s5, 4  ;;  %s219_s23 = sshll.u32 %s215_s4, 4  ;;  %s218_s6 = int_to_ptr.vmem [resolvable:$true] %s217_s6  ;;  %s220_s23 = int_to_ptr.hbm [resolvable:$true] %s219_s23 }
  0x24   : > { %s194_s28 = scalar_lea.vmem %s648_s2, %s193_s20  ;;  %s203_s7 = scalar_lea.sflag [#allocation6], %s595_s10 }
  0x25   : > { %v386_v1 = vld [vmem:[%s194_s28] ss:$0 sm:$0xff]  ;;  %s431_s0 = sshra.s32 %s220_s23, 4  ;;  %s437_s11 = scalar_lea.hbm %s649_s3, 4  ;;  %s432_s0 = int_to_ptr.hbm [resolvable:$true] %s431_s0 }
  0x26   : > { %v200_v2 = vadd.f32 %v386_v1, %v195_v0  ;;  %s433_s8 = scalar_lea.hbm %s432_s0, 2  ;;  %p438_p8 = scmp.lt.s32.totalorder %s432_s0, %s649_s3 }
  0x27   : > { %p434_p5 = scmp.ne.s32.totalorder %s432_s0, %s433_s8  ;;  %p439_p10 = scmp.lt.s32.totalorder %s437_s11, %s433_s8 }
  0x28   : > { %201 = vst [vmem:[%s191_s5] sm:$0x3] %v200_v2 }
  0x29   : > { %p435_p6 = pnand %p434_p5, %p572_p9  ;;  %p440_p13 = por %p439_p10, %p438_p8 }
  0x2b   : > { %p436_p7 = pneg %p435_p6 }
  0x2d   : > { %p441_p0 = pnand %p440_p13, %p436_p7 }
  0x2f   : > { %444 = shalt.err (!%p441_p0)
}
  0x30   : > { %326 = dma.vmem_to_hbm [thread:$0]  (%p572_p9), %s218_s6, 32, %s220_s23, %s203_s7  }
  0x31 PF: > { %s231_s10 = sand.u32 1, %s479_s12   ;;  %p333_p1 = pnand %p314_p12, %p579_p11 }
  0x32   : > { %s232_s18 = scalar_lea.sflag [#allocation6], %s231_s10 }
  0x33   : > { %p334_p2 = pneg %p333_p1 }
  0x35   : > { %474 = dma.done.wait (%p334_p2), %s232_s18, 32  }
  0x36   : > { %476 = vsyncadd (%p334_p2), %s232_s18, 4294967264  ;;  %s20_s16 = sadd.s32 1, %s499_s16   ;;  %s654_s12 = smov %s483_s13 }
  0x37   : > { %p17_p3 = scmp.ge.s32.totalorder %s20_s16, 4   ;;  %s655_s13 = smov %s487_s14 }
  0x38   : > { %s656_s14 = smov %s577_s25  ;;  %s657_s0 = smov %s495_s15 }
  0x39   : > { %s658_s15 = smov %s660_s19  ;;  %19 = sbr.rel (!%p17_p3) target bundleno = 6 (0x6), region = 76 }
  0x3e   :  { %238 = vsyncpa [#allocation5], 1 }
  0x3f   :  { %240 = vsyncpa [#allocation5 + $0x1], 1 }
  0x40   :  { %241 = vsyncpa [#allocation6], 1 }
  0x41   :  { %243 = vsyncpa [#allocation6 + $0x1], 1 }

</bundles_post_ra>
